<compile_context>
chip_gen: v6e
topology: v6e:2x2x1
jax: 0.10.0
libtpu: 0.0.40
codegen_flags: <defaults>
</compile_context>

<pallas_src>
import functools
import math

import jax
import jax.numpy as jnp
from jax.experimental import pallas as pl
from jax.experimental.pallas import tpu as pltpu

LANE = 128
SUBLANE = 8
ROW_ALIGN = 32           # int8 truth native tile is (32, 128)
CHUNK_ROWS = 32          # inner accumulation chunk: (32,128) f32 = 4 vregs / operand
MAX_BLOCK_ROWS = 8192    # 8192x128 f32 = 4 MiB logits per block (double-buffered)
TINY_ROWS = 2 * ROW_ALIGN
_LN2 = math.log(2.0)


def _cdiv(a, b):
    return (a + b - 1) // b


def _round_up(a, b):
    return _cdiv(a, b) * b


def _edge_stats_kernel(x_ref, y_ref, o_ref, *, chunk_rows, chunks_full,
                       chunks_last, last_rows_valid, mask_last, num_blocks):
    """Per-block edge-loss statistics.

    x_ref: (block_rows, 128) logits (native dtype); y_ref: (block_rows, 128)
    truth labels {0,1} (native int dtype).  o_ref: (1, 5, 8, 128) f32 partial
    sums for this block:
      [0] sum(y)       [1] sum(bce)     [2] sum(bce*y)
      [3] sum(x<0)     [4] sum((x<0)*y)
    The last grid block may cover rows past the materialized array; those rows
    are zero-filled (row mask) and their ln(2) BCE contribution is removed in
    the wrapper epilogue.
    """

    def accumulate(nchunks, valid_rows):
        # valid_rows is a *static* int (only used in the last block) or None.
        def body(c, carry):
            r0 = pl.multiple_of(c * chunk_rows, chunk_rows)
            x = x_ref[pl.ds(r0, chunk_rows), :].astype(jnp.float32)
            y = y_ref[pl.ds(r0, chunk_rows), :].astype(jnp.float32)
            if valid_rows is not None:
                row = r0 + jax.lax.broadcasted_iota(jnp.int32, (chunk_rows, LANE), 0)
                ok = row < valid_rows
                x = jnp.where(ok, x, 0.0)   # zero-filled rows contribute exactly ln(2)
                y = jnp.where(ok, y, 0.0)   # to bce and 0 to every other statistic
            # Numerically stable binary_cross_entropy_with_logits (VPU + EUP).
            bce = jnp.maximum(x, 0.0) - x * y + jnp.log1p(jnp.exp(-jnp.abs(x)))
            xneg = (x < 0.0).astype(jnp.float32)

            def fold(v):
                # (chunk_rows,128) -> (8,128): layout-preserving reshape + VPU adds.
                return jnp.sum(v.reshape(chunk_rows // SUBLANE, SUBLANE, LANE), axis=0)

            sy, sb, sby, sx, sxy = carry
            return (sy + fold(y), sb + fold(bce), sby + fold(bce * y),
                    sx + fold(xneg), sxy + fold(xneg * y))

        zeros = jnp.zeros((SUBLANE, LANE), jnp.float32)
        return jax.lax.fori_loop(0, nchunks, body, (zeros,) * 5)

    def write(stats):
        for k, s in enumerate(stats):
            o_ref[0, k] = s

    if num_blocks == 1:
        write(accumulate(chunks_last, last_rows_valid if mask_last else None))
    elif not (mask_last or chunks_last != chunks_full):
        # All blocks identical: single mask-free hot path.
        write(accumulate(chunks_full, None))
    else:
        i = pl.program_id(0)

        @pl.when(i < num_blocks - 1)
        def _():
            write(accumulate(chunks_full, None))

        @pl.when(i == num_blocks - 1)
        def _():
            write(accumulate(chunks_last, last_rows_valid if mask_last else None))


def weighted_edge_loss_tpu(edge_pred, edge_truth):
    """edge_pred: (E,) or (E,1) logits; edge_truth: (E,) {0,1} labels (any int/bool/float dtype).

    Returns (weighted BCE-with-logits mean loss, F1-style edge accuracy) as f32 scalars.
    """
    x = jnp.reshape(edge_pred, (-1,))
    y = jnp.reshape(edge_truth, (-1,))
    if y.dtype == jnp.bool_:
        y = y.astype(jnp.int8)
    E = x.shape[0]
    R = _cdiv(E, LANE)

    if R <= TINY_ROWS:
        # Tiny problem: one block that exactly equals the (row-padded) array.
        block_rows = _round_up(max(R, 1), SUBLANE)
        chunk_rows = block_rows
        rows = block_rows
    else:
        # Large blocks (amortize per-step overhead), but always >= 2 blocks so the
        # "parallel" grid axis shards across v7x's two TensorCores.
        block_rows = min(MAX_BLOCK_ROWS, _round_up(_cdiv(R, 2), ROW_ALIGN))
        chunk_rows = CHUNK_ROWS
        rows = R
    grid = _cdiv(rows, block_rows)

    e_rows = rows * LANE
    if e_rows != E:
        # Minimal lane-alignment pad (< 128 zeros for the main path).  This is the
        # only remaining whole-array copy and only triggers for ragged E; aligned E
        # takes the zero-copy reshape below.
        # TODO(synk): a fully copy-free ragged path needs rank-1 VMEM blocks.
        x = jnp.pad(x, (0, e_rows - E))
        y = jnp.pad(y, (0, e_rows - E))
    x2 = x.reshape(rows, LANE)   # free (layout-preserving) reshape
    y2 = y.reshape(rows, LANE)

    chunks_full = block_rows // chunk_rows
    last_rows_valid = rows - (grid - 1) * block_rows
    chunks_last = _cdiv(last_rows_valid, chunk_rows)
    mask_last = last_rows_valid < chunks_last * chunk_rows
    processed = ((grid - 1) * block_rows + chunks_last * chunk_rows) * LANE
    zero_filled = processed - E   # zero-valued (pad / masked) elements seen by kernel

    kernel = functools.partial(
        _edge_stats_kernel, chunk_rows=chunk_rows, chunks_full=chunks_full,
        chunks_last=chunks_last, last_rows_valid=last_rows_valid,
        mask_last=mask_last, num_blocks=grid)

    out_bytes = grid * 5 * SUBLANE * LANE * 4
    partials = pl.pallas_call(
        kernel,
        out_shape=jax.ShapeDtypeStruct((grid, 5, SUBLANE, LANE), jnp.float32),
        grid_spec=pltpu.PrefetchScalarGridSpec(
            num_scalar_prefetch=0,
            grid=(grid,),
            in_specs=[pl.BlockSpec((block_rows, LANE), lambda i: (i, 0)),
                      pl.BlockSpec((block_rows, LANE), lambda i: (i, 0))],
            out_specs=pl.BlockSpec((1, 5, SUBLANE, LANE),
                                   lambda i: (i, 0, 0, 0))),
        compiler_params=pltpu.CompilerParams(
            dimension_semantics=("parallel",),
            vmem_limit_bytes=32 * 1024 * 1024),
        cost_estimate=pl.CostEstimate(
            flops=18 * processed,
            transcendentals=2 * processed,
            bytes_accessed=(rows * LANE * (x2.dtype.itemsize + y2.dtype.itemsize)
                            + out_bytes)),
    )(x2, y2)

    # Tiny epilogue in plain JAX: one reduction over the per-block partial sums.
    sums = jnp.sum(partials, axis=(0, 2, 3))          # (5,)
    num_pos = sums[0]
    bce_total = sums[1]
    if zero_filled:
        # Every zero-filled element (x=0, y=0) contributed exactly ln(2) to BCE.
        bce_total = bce_total - jnp.float32(zero_filled * _LN2)
    bce_pos = sums[2]
    xneg_total = sums[3]
    xneg_pos = sums[4]

    n = jnp.float32(E)
    # WeightedEdgeLoss: negatives weighted w = 1/(1 - num_pos/n), positives 1;
    # loss = mean of weighted per-edge BCE.  (w is inf/NaN when every edge is
    # positive — identical behavior to the PyTorch reference.)
    w = 1.0 / (1.0 - num_pos / n)
    edge_loss = (bce_pos + w * (bce_total - bce_pos)) / n

    tn = xneg_total - xneg_pos                        # (x<0) & (y==0); assumes y in {0,1}
    precision = tn / ((n - num_pos) + 1e-6)
    recall = tn / (xneg_total + 1e-6)
    f1 = precision * recall / (precision + recall + 1e-6)
    return edge_loss, f1


def sparse_occuseg_gnn_loss_forward(result, segment_label, cluster_label,
                                    is_eval=False):
    """JAX mirror of SparseOccuSegGNNLoss.forward."""
    # TODO(synk): SparseOccuSegLoss (cfg-dependent embedding/seediness clustering
    # loss) is not defined in the provided module source; its contribution to
    # res['loss'] is taken as 0 here.
    res = {'loss': jnp.float32(0.0)}

    node_pred = result['node_pred'][0]  # extracted (as in the reference) but unused here
    edge_pred = result['edge_pred'][0]

    if not is_eval:
        edge_truth = result['edge_truth'][0]
        edge_loss, f1 = weighted_edge_loss_tpu(jnp.squeeze(edge_pred), edge_truth)
        res['edge_accuracy'] = f1
    else:
        edge_loss = jnp.float32(0.0)

    res['loss'] = res['loss'] + edge_loss
    res['edge_loss'] = edge_loss
    return res


def _reference_edge_loss(edge_pred, edge_truth):
    x = jnp.reshape(edge_pred, (-1,)).astype(jnp.float32)
    y = jnp.reshape(edge_truth, (-1,)).astype(jnp.float32)
    n = x.shape[0]
    num_pos = jnp.sum(y)
    w = 1.0 / (1.0 - num_pos / n)
    weight = jnp.where(y == 0.0, w, 1.0)
    bce = jnp.maximum(x, 0.0) - x * y + jnp.log1p(jnp.exp(-jnp.abs(x)))
    loss = jnp.mean(weight * bce)
    tn = jnp.sum(((x < 0.0) & (y == 0.0)).astype(jnp.float32))
    precision = tn / (jnp.sum((y == 0.0).astype(jnp.float32)) + 1e-6)
    recall = tn / (jnp.sum((x < 0.0).astype(jnp.float32)) + 1e-6)
    f1 = precision * recall / (precision + recall + 1e-6)
    return loss, f1


if __name__ == "__main__":
    key = jax.random.PRNGKey(0)
    k1, k2, k3, k4, k5 = jax.random.split(key, 5)

    E = 4096          # number of graph edges (128-aligned: zero-copy path, grid=1)
    N = 64            # number of graph nodes
    NODE_FEATS = 2

    edge_pred = jax.random.normal(k1, (E, 1), dtype=jnp.float32)
    edge_truth = jax.random.bernoulli(k2, 0.3, (E,)).astype(jnp.int8)  # narrow dtype
    node_pred = jax.random.normal(k3, (N, NODE_FEATS), dtype=jnp.float32)

    # Placeholder label tensors (consumed only by the untranslated SparseOccuSegLoss).
    segment_label = [jax.random.randint(k4, (N, 6), 0, 5).astype(jnp.float32)]
    cluster_label = [jax.random.randint(k5, (N, 7), 0, 5).astype(jnp.float32)]

    result = {
        'node_pred': [node_pred],
        'edge_pred': [edge_pred],
        'edge_truth': [edge_truth],
    }

    res = sparse_occuseg_gnn_loss_forward(result, segment_label, cluster_label,
                                          is_eval=False)
    jax.block_until_ready(res['loss'])

    ref_loss, ref_f1 = _reference_edge_loss(edge_pred, edge_truth)
    assert jnp.allclose(res['edge_loss'], ref_loss, rtol=1e-4, atol=1e-5)
    assert jnp.allclose(res['edge_accuracy'], ref_f1, rtol=1e-4, atol=1e-5)
    assert jnp.allclose(res['loss'], ref_loss, rtol=1e-4, atol=1e-5)

    # Exercise the other static code paths:
    #   E=1000  -> tiny single block, ragged (lane pad + ln2 correction)
    #   E=12288 -> grid=2, aligned, last block shorter but unmasked
    #   E=20000 -> grid=2, ragged, masked last block
    for ks, E_extra in ((10, 1000), (20, 12288), (30, 20000)):
        ka, kb = jax.random.split(jax.random.PRNGKey(ks))
        ep = jax.random.normal(ka, (E_extra,), dtype=jnp.float32)
        et = jax.random.bernoulli(kb, 0.3, (E_extra,)).astype(jnp.int8)
        loss_k, f1_k = weighted_edge_loss_tpu(ep, et)
        jax.block_until_ready(loss_k)
        loss_r, f1_r = _reference_edge_loss(ep, et)
        assert jnp.allclose(loss_k, loss_r, rtol=1e-4, atol=1e-5)
        assert jnp.allclose(f1_k, f1_r, rtol=1e-4, atol=1e-5)

    print("KERNEL_OK")
</pallas_src>

<mosaic_0001>
module attributes {stable_mosaic.version = 11 : i64} {
  func.func @_edge_stats_kernel(%arg0: i32, %arg1: memref<32x128xf32, #tpu.memory_space<vmem>>, %arg2: memref<32x128xi8, #tpu.memory_space<vmem>>, %arg3: memref<1x5x8x128xf32, #tpu.memory_space<vmem>>) attributes {dimension_semantics = [#tpu.dimension_semantics<parallel>], iteration_bounds = array<i64: 1>, scalar_prefetch = 0 : i64, scratch_operands = 0 : i64, tpu.core_type = #tpu.core_type<tc>, window_params = [{transform_indices = @transform_0, window_bounds = array<i64: 32, 128>}, {transform_indices = @transform_1, window_bounds = array<i64: 32, 128>}, {transform_indices = @transform_2, window_bounds = array<i64: 1, 5, 8, 128>}]} {
    %cst = arith.constant 0.000000e+00 : f32
    %0 = vector.broadcast %cst : f32 to vector<8x128xf32>
    %c0_i32 = arith.constant 0 : i32
    %c32_i32 = arith.constant 32 : i32
    %1 = arith.muli %c0_i32, %c32_i32 : i32
    %2 = tpu.assume_multiple %1, 32 : i32
    %3 = arith.index_cast %2 : i32 to index
    %c0 = arith.constant 0 : index
    %4 = vector.load %arg1[%3, %c0] : memref<32x128xf32, #tpu.memory_space<vmem>>, vector<32x128xf32>
    %5 = arith.index_cast %2 : i32 to index
    %c0_0 = arith.constant 0 : index
    %6 = vector.load %arg2[%5, %c0_0] : memref<32x128xi8, #tpu.memory_space<vmem>>, vector<32x128xi8>
    %7 = arith.sitofp %6 : vector<32x128xi8> to vector<32x128xf32>
    %cst_1 = arith.constant 0.000000e+00 : f32
    %8 = vector.broadcast %cst_1 : f32 to vector<32x128xf32>
    %9 = arith.maximumf %4, %8 : vector<32x128xf32>
    %10 = arith.mulf %4, %7 : vector<32x128xf32>
    %11 = arith.subf %9, %10 : vector<32x128xf32>
    %12 = math.absf %4 : vector<32x128xf32>
    %cst_2 = arith.constant 0.000000e+00 : f32
    %13 = vector.broadcast %cst_2 : f32 to vector<32x128xf32>
    %14 = arith.subf %13, %12 : vector<32x128xf32>
    %15 = math.exp %14 : vector<32x128xf32>
    %16 = math.log1p %15 : vector<32x128xf32>
    %17 = arith.addf %11, %16 : vector<32x128xf32>
    %cst_3 = arith.constant 0.000000e+00 : f32
    %18 = vector.broadcast %cst_3 : f32 to vector<32x128xf32>
    %19 = arith.cmpf olt, %4, %18 : vector<32x128xf32>
    %20 = arith.extui %19 : vector<32x128xi1> to vector<32x128xi32>
    %21 = arith.sitofp %20 : vector<32x128xi32> to vector<32x128xf32>
    %22 = vector.shape_cast %7 : vector<32x128xf32> to vector<4x8x128xf32>
    %cst_4 = arith.constant dense<0.000000e+00> : vector<8x128xf32>
    %23 = vector.multi_reduction <add>, %22, %cst_4 [0] : vector<4x8x128xf32> to vector<8x128xf32>
    %24 = arith.addf %0, %23 : vector<8x128xf32>
    %25 = vector.shape_cast %17 : vector<32x128xf32> to vector<4x8x128xf32>
    %cst_5 = arith.constant dense<0.000000e+00> : vector<8x128xf32>
    %26 = vector.multi_reduction <add>, %25, %cst_5 [0] : vector<4x8x128xf32> to vector<8x128xf32>
    %27 = arith.addf %0, %26 : vector<8x128xf32>
    %28 = arith.mulf %17, %7 : vector<32x128xf32>
    %29 = vector.shape_cast %28 : vector<32x128xf32> to vector<4x8x128xf32>
    %cst_6 = arith.constant dense<0.000000e+00> : vector<8x128xf32>
    %30 = vector.multi_reduction <add>, %29, %cst_6 [0] : vector<4x8x128xf32> to vector<8x128xf32>
    %31 = arith.addf %0, %30 : vector<8x128xf32>
    %32 = vector.shape_cast %21 : vector<32x128xf32> to vector<4x8x128xf32>
    %cst_7 = arith.constant dense<0.000000e+00> : vector<8x128xf32>
    %33 = vector.multi_reduction <add>, %32, %cst_7 [0] : vector<4x8x128xf32> to vector<8x128xf32>
    %34 = arith.addf %0, %33 : vector<8x128xf32>
    %35 = arith.mulf %21, %7 : vector<32x128xf32>
    %36 = vector.shape_cast %35 : vector<32x128xf32> to vector<4x8x128xf32>
    %cst_8 = arith.constant dense<0.000000e+00> : vector<8x128xf32>
    %37 = vector.multi_reduction <add>, %36, %cst_8 [0] : vector<4x8x128xf32> to vector<8x128xf32>
    %38 = arith.addf %0, %37 : vector<8x128xf32>
    %c1_i32 = arith.constant 1 : i32
    %c0_9 = arith.constant 0 : index
    %c0_10 = arith.constant 0 : index
    %c0_11 = arith.constant 0 : index
    %c0_12 = arith.constant 0 : index
    %39 = vector.load %arg3[%c0_9, %c0_10, %c0_11, %c0_12] : memref<1x5x8x128xf32, #tpu.memory_space<vmem>>, vector<1x1x8x128xf32>
    %40 = vector.shape_cast %39 : vector<1x1x8x128xf32> to vector<8x128xf32>
    %41 = vector.shape_cast %24 : vector<8x128xf32> to vector<1x1x8x128xf32>
    tpu.vector_store %arg3[%c0_9, %c0_10, %c0_11, %c0_12], %41 {strides = array<i32>} : memref<1x5x8x128xf32, #tpu.memory_space<vmem>>, vector<1x1x8x128xf32>,
    %c0_13 = arith.constant 0 : index
    %c1 = arith.constant 1 : index
    %c0_14 = arith.constant 0 : index
    %c0_15 = arith.constant 0 : index
    %42 = vector.load %arg3[%c0_13, %c1, %c0_14, %c0_15] : memref<1x5x8x128xf32, #tpu.memory_space<vmem>>, vector<1x1x8x128xf32>
    %43 = vector.shape_cast %42 : vector<1x1x8x128xf32> to vector<8x128xf32>
    %44 = vector.shape_cast %27 : vector<8x128xf32> to vector<1x1x8x128xf32>
    tpu.vector_store %arg3[%c0_13, %c1, %c0_14, %c0_15], %44 {strides = array<i32>} : memref<1x5x8x128xf32, #tpu.memory_space<vmem>>, vector<1x1x8x128xf32>,
    %c0_16 = arith.constant 0 : index
    %c2 = arith.constant 2 : index
    %c0_17 = arith.constant 0 : index
    %c0_18 = arith.constant 0 : index
    %45 = vector.load %arg3[%c0_16, %c2, %c0_17, %c0_18] : memref<1x5x8x128xf32, #tpu.memory_space<vmem>>, vector<1x1x8x128xf32>
    %46 = vector.shape_cast %45 : vector<1x1x8x128xf32> to vector<8x128xf32>
    %47 = vector.shape_cast %31 : vector<8x128xf32> to vector<1x1x8x128xf32>
    tpu.vector_store %arg3[%c0_16, %c2, %c0_17, %c0_18], %47 {strides = array<i32>} : memref<1x5x8x128xf32, #tpu.memory_space<vmem>>, vector<1x1x8x128xf32>,
    %c0_19 = arith.constant 0 : index
    %c3 = arith.constant 3 : index
    %c0_20 = arith.constant 0 : index
    %c0_21 = arith.constant 0 : index
    %48 = vector.load %arg3[%c0_19, %c3, %c0_20, %c0_21] : memref<1x5x8x128xf32, #tpu.memory_space<vmem>>, vector<1x1x8x128xf32>
    %49 = vector.shape_cast %48 : vector<1x1x8x128xf32> to vector<8x128xf32>
    %50 = vector.shape_cast %34 : vector<8x128xf32> to vector<1x1x8x128xf32>
    tpu.vector_store %arg3[%c0_19, %c3, %c0_20, %c0_21], %50 {strides = array<i32>} : memref<1x5x8x128xf32, #tpu.memory_space<vmem>>, vector<1x1x8x128xf32>,
    %c0_22 = arith.constant 0 : index
    %c4 = arith.constant 4 : index
    %c0_23 = arith.constant 0 : index
    %c0_24 = arith.constant 0 : index
    %51 = vector.load %arg3[%c0_22, %c4, %c0_23, %c0_24] : memref<1x5x8x128xf32, #tpu.memory_space<vmem>>, vector<1x1x8x128xf32>
    %52 = vector.shape_cast %51 : vector<1x1x8x128xf32> to vector<8x128xf32>
    %53 = vector.shape_cast %38 : vector<8x128xf32> to vector<1x1x8x128xf32>
    tpu.vector_store %arg3[%c0_22, %c4, %c0_23, %c0_24], %53 {strides = array<i32>} : memref<1x5x8x128xf32, #tpu.memory_space<vmem>>, vector<1x1x8x128xf32>,
    return
  }
  func.func @transform_0(%arg0: i32) -> (i32, i32) {
    %c0_i32 = arith.constant 0 : i32
    %c0_i32_0 = arith.constant 0 : i32
    return %arg0, %c0_i32 : i32, i32
  }
  func.func @transform_1(%arg0: i32) -> (i32, i32) {
    %c0_i32 = arith.constant 0 : i32
    %c0_i32_0 = arith.constant 0 : i32
    return %arg0, %c0_i32 : i32, i32
  }
  func.func @transform_2(%arg0: i32) -> (i32, i32, i32, i32) {
    %c0_i32 = arith.constant 0 : i32
    %c0_i32_0 = arith.constant 0 : i32
    %c0_i32_1 = arith.constant 0 : i32
    %c0_i32_2 = arith.constant 0 : i32
    return %arg0, %c0_i32, %c0_i32_0, %c0_i32_1 : i32, i32, i32, i32
  }
}

</mosaic_0001>

<bundles_post_ra>
// kernel: tpu_custom_call.1
= control target key start
LH: loop header
LB: loop body
LE: loop exit
PB: predicated region body
PF: predicated region fallthrough
CT: control target
= control target key end

     0   :  { %7 = vsyncpa [#allocation3], 0  ;;  %s374_s0 = inlined_call_operand.hbm [shape: f32[32,128], index: 0, kind: input, shape index: {}]   ;;  %s375_s1 = inlined_call_operand.hbm [shape: s8[32,128], index: 1, kind: input, shape index: {}]   ;;  %s376_s2 = inlined_call_operand.hbm [shape: f32[1,5,8,128], index: 2, kind: output, shape index: {}]  }
   0x1   :  { %8 = vsyncpa [#allocation6], 0 }
   0x2   :  { %9 = vsyncpa [#allocation4], 0  ;;  %s278_s9 = smov [#allocation2]  }
   0x3   :  { %s15_s10 = sshll.u32 %s278_s9, 4  ;;  %s16_s10 = int_to_ptr.vmem [resolvable:$true] %s15_s10 }
   0x4   :  { %s220_s11 = scalar_lea.vmem %s16_s10, 512  ;;  %p225_p1 = scmp.lt.s32.totalorder %s16_s10, %s16_s10 }
   0x5   :  { %p221_p0 = scmp.ne.s32.totalorder %s16_s10, %s220_s11  ;;  %p226_p2 = scmp.lt.s32.totalorder %s220_s11, %s220_s11 }
   0x7   :  { %p227_p3 = por %p226_p2, %p225_p1 }
   0x9   :  { %p228_p4 = pnand %p227_p3, %p221_p0 }
   0xb   :  { %231 = shalt.err (!%p228_p4)
}
   0xc   :  { %s279_s12 = smov 128   ;;  %s280_s13 = smov 8  }
   0xd   :  { %21 = dma.hbm_to_vmem [thread:$0]  %s374_s0, 512, %s16_s10, [#allocation3], %s279_s12, %s279_s12, %s280_s13  }
   0xe   :  { %s281_s16 = smov [#allocation5]  }
   0xf   :  { %s28_s17 = sshll.u32 %s281_s16, 4  ;;  %s29_s17 = int_to_ptr.vmem [resolvable:$true] %s28_s17 }
  0x10   :  { %s240_s18 = scalar_lea.vmem %s29_s17, 128  ;;  %p245_p6 = scmp.lt.s32.totalorder %s29_s17, %s29_s17 }
  0x11   :  { %p241_p5 = scmp.ne.s32.totalorder %s29_s17, %s240_s18  ;;  %p246_p7 = scmp.lt.s32.totalorder %s240_s18, %s240_s18 }
  0x13   :  { %p247_p8 = por %p246_p7, %p245_p6 }
  0x15   :  { %p248_p9 = pnand %p247_p8, %p241_p5 }
  0x17   :  { %251 = shalt.err (!%p248_p9)
}
  0x18   :  { %31 = dma.hbm_to_vmem [thread:$0]  %s375_s1, 128, %s29_s17, [#allocation6]  }
  0x19   :  { %272 = dma.done.wait [#allocation3], 512  }
  0x1a   :  { %273 = vsyncadd [#allocation3], 4294966784 }
  0x1b   :  { %274 = dma.done.wait [#allocation6], 128  }
  0x1c   :  { %275 = vsyncadd [#allocation6], 4294967168  ;;  %v42_v0 = vld [vmem:[#allocation5] sm:$0xff]  ;;  %v310_v5 = vld [vmem:[#allocation2 + $0x8] sm:$0xff]  ;;  %v282_v28 = vmov 0.0   ;;  %s283_s0 = smov [#allocation7]  }
  0x1d   :  { %v43_v1 = vunpack.c.0.s8 %v42_v0  ;;  %v44_v2 = vunpack.c.1.s8 %v42_v0  ;;  %v45_v3 = vunpack.c.2.s8 %v42_v0  ;;  %v308_v4 = vld [vmem:[#allocation2] sm:$0xff]  ;;  %v312_v6 = vld [vmem:[#allocation2 + $0x10] sm:$0xff]  ;;  %v46_v7 = vunpack.c.3.s8 %v42_v0  ;;  %v318_v10 = vld [vmem:[#allocation2 + $0x18] sm:$0xff]  ;;  %s173_s1 = sshll.u32 %s283_s0, 4  ;;  %s174_s1 = int_to_ptr.vmem [resolvable:$true] %s173_s1 }
  0x1e   :  { %v63_v11 = vand.u32 2147483647, %v308_v4  ;;  %v64_v12 = vand.u32 2147483647, %v310_v5  ;;  %v65_v13 = vand.u32 2147483647, %v312_v6  ;;  %p257_p11 = scmp.lt.s32.totalorder %s174_s1, %s174_s1 }
  0x1f   :  { %v314_v8 = vcvt.s32.f32 %v43_v1  ;;  %v316_v9 = vcvt.s32.f32 %v44_v2  ;;  %v323_v14 = vcvt.s32.f32 %v45_v3  ;;  %v66_v16 = vand.u32 2147483647, %v318_v10  ;;  %s252_s21 = scalar_lea.vmem %s174_s1, 640 }
  0x20   :  { %v67_v17 = vsub.f32 0.0, %v63_v11  ;;  %v68_v18 = vsub.f32 0.0, %v64_v12  ;;  %v328_v19 = vcvt.s32.f32 %v46_v7  ;;  %v69_v21 = vsub.f32 0.0, %v65_v13  ;;  %p253_p10 = scmp.ne.s32.totalorder %s174_s1, %s252_s21  ;;  %p258_p12 = scmp.lt.s32.totalorder %s252_s21, %s252_s21 }
  0x21   :  { %v131_v15 = vadd.f32 %v316_v9, %v314_v8  ;;  %v70_v22 = vsub.f32 0.0, %v66_v16  ;;  %vm119_vm0 = vcmp.lt.f32.partialorder %v308_v4, 0.0  ;;  %vm120_vm1 = vcmp.lt.f32.partialorder %v310_v5, 0.0 }
  0x22   :  { %v71_v23 = vmul.f32 1.442695, %v67_v17  ;;  %v73_v25 = vmul.f32 1.442695, %v68_v18  ;;  %v75_v26 = vmul.f32 1.442695, %v69_v21  ;;  %v55_v57 = vmul.f32 %v314_v8, %v308_v4  ;;  %p259_p13 = por %p258_p12, %p257_p11 }
  0x23   :  { %v132_v20 = vadd.f32 %v131_v15, %v323_v14  ;;  %v77_v27 = vmul.f32 1.442695, %v70_v22  ;;  %vm121_vm2 = vcmp.lt.f32.partialorder %v312_v6, 0.0  ;;  %vm122_vm3 = vcmp.lt.f32.partialorder %v318_v10, 0.0 }
  0x24   :  { %196 = vpow2.f32 %v71_v23  ;;  %v186_v29 = vsel %vm119_vm0, 1.0, %v282_v28  ;;  %v187_v30 = vsel %vm120_vm1, 1.0, %v282_v28  ;;  %v188_v31 = vsel %vm121_vm2, 1.0, %v282_v28  ;;  %p260_p0 = pnand %p259_p13, %p253_p10 }
  0x25   :  { %v133_v24 = vadd.f32 %v132_v20, %v328_v19  ;;  %198 = vpow2.f32 %v73_v25  ;;  %v189_v32 = vsel %vm122_vm3, 1.0, %v282_v28  ;;  %v147_v33 = vadd.f32 %v187_v30, %v186_v29 }
  0x26   :  { %200 = vpow2.f32 %v75_v26  ;;  %v151_v34 = vmul.f32 %v186_v29, %v314_v8  ;;  %v152_v35 = vmul.f32 %v187_v30, %v316_v9  ;;  %v153_v36 = vmul.f32 %v188_v31, %v323_v14 }
  0x27   :  { %159 = vst [vmem:[#allocation7] sm:$0xff] %v133_v24  ;;  %202 = vpow2.f32 %v77_v27  ;;  %v148_v37 = vadd.f32 %v188_v31, %v147_v33  ;;  %v154_v38 = vmul.f32 %v189_v32, %v328_v19  ;;  %v51_v56 = vmax.f32 %v308_v4, 0.0 }
  0x28   :  { %v155_v39 = vadd.f32 %v152_v35, %v151_v34  ;;  %v52_v60 = vmax.f32 %v310_v5, 0.0  ;;  %v56_v61 = vmul.f32 %v316_v9, %v310_v5  ;;  %v53_v0 = vmax.f32 %v312_v6, 0.0 }
  0x29   :  { %v149_v40 = vadd.f32 %v189_v32, %v148_v37  ;;  %v57_v1 = vmul.f32 %v323_v14, %v312_v6  ;;  %v54_v3 = vmax.f32 %v318_v10, 0.0  ;;  %v58_v4 = vmul.f32 %v328_v19, %v318_v10 }
  0x2a   :  { %v156_v41 = vadd.f32 %v155_v39, %v153_v36  ;;  %v59_v13 = vsub.f32 %v51_v56, %v55_v57  ;;  %v60_v18 = vsub.f32 %v52_v60, %v56_v61 }
  0x2b   :  { %165 = vst [vmem:[#allocation7 + $0x18] sm:$0xff] %v149_v40  ;;  %v61_v10 = vsub.f32 %v53_v0, %v57_v1  ;;  %v62_v28 = vsub.f32 %v54_v3, %v58_v4 }
  0x2c   :  { %v157_v42 = vadd.f32 %v156_v41, %v154_v38 }
  0x2e   :  { %167 = vst [vmem:[#allocation7 + $0x20] sm:$0xff] %v157_v42 }
  0x31   :  { %v197_v43 = vpop.eup %196 }
  0x32   :  { %v199_v44 = vpop.eup %198  ;;  %v79_v45 = vadd.f32 1.0, %v197_v43  ;;  %v82_v51 = vmul.f32 -0.5, %v197_v43  ;;  %v85_v58 = vand.u32 2147483647, %v197_v43 }
  0x33   :  { %v201_v46 = vpop.eup %200  ;;  %v88_v47 = vadd.f32 1.0, %v199_v44  ;;  %v91_v52 = vmul.f32 -0.5, %v199_v44  ;;  %v94_v62 = vand.u32 2147483647, %v199_v44 }
  0x34   :  { %v203_v48 = vpop.eup %202  ;;  %204 = vlog2.f32 %v79_v45  ;;  %v97_v49 = vadd.f32 1.0, %v201_v46  ;;  %v100_v53 = vmul.f32 -0.5, %v201_v46  ;;  %v83_v54 = vadd.f32 1.0, %v82_v51 }
  0x35   :  { %206 = vlog2.f32 %v88_v47  ;;  %v106_v50 = vadd.f32 1.0, %v203_v48  ;;  %v109_v55 = vmul.f32 -0.5, %v203_v48  ;;  %v92_v59 = vadd.f32 1.0, %v91_v52 }
  0x36   :  { %208 = vlog2.f32 %v97_v49  ;;  %v101_v63 = vadd.f32 1.0, %v100_v53  ;;  %v103_v2 = vand.u32 2147483647, %v201_v46  ;;  %v84_v7 = vmul.f32 %v197_v43, %v83_v54 }
  0x37   :  { %210 = vlog2.f32 %v106_v50  ;;  %v110_v11 = vadd.f32 1.0, %v109_v55  ;;  %vm352_vm4 = vcmp.lt.f32.partialorder %v85_v58, 0.0004427343  ;;  %v93_v5 = vmul.f32 %v199_v44, %v92_v59 }
  0x38   :  { %v112_v16 = vand.u32 2147483647, %v203_v48  ;;  %vm356_vm5 = vcmp.lt.f32.partialorder %v94_v62, 0.0004427343  ;;  %v102_v21 = vmul.f32 %v201_v46, %v101_v63  ;;  %vm104_vm6 = vcmp.lt.f32.partialorder %v103_v2, 0.0004427343 }
  0x39   :  { %v111_v26 = vmul.f32 %v203_v48, %v110_v11 }
  0x3a   :  { %vm113_vm7 = vcmp.lt.f32.partialorder %v112_v16, 0.0004427343 }
  0x41   :  { %v205_v12 = vpop.eup %204 }
  0x42   :  { %v207_v17 = vpop.eup %206  ;;  %v81_v20 = vmul.f32 0.6931472, %v205_v12 }
  0x43   :  { %v209_v22 = vpop.eup %208  ;;  %v90_v23 = vmul.f32 0.6931472, %v207_v17 }
  0x44   :  { %v87_v24 = vsel %vm352_vm4, %v84_v7, %v81_v20  ;;  %v99_v25 = vmul.f32 0.6931472, %v209_v22  ;;  %v211_v27 = vpop.eup %210 }
  0x45   :  { %v96_v29 = vsel %vm356_vm5, %v93_v5, %v90_v23  ;;  %v115_v30 = vadd.f32 %v87_v24, %v59_v13  ;;  %v108_v32 = vmul.f32 0.6931472, %v211_v27 }
  0x46   :  { %v105_v31 = vsel %vm104_vm6, %v102_v21, %v99_v25  ;;  %v116_v33 = vadd.f32 %v96_v29, %v60_v18 }
  0x47   :  { %v117_v34 = vadd.f32 %v105_v31, %v61_v10  ;;  %v139_v35 = vmul.f32 %v115_v30, %v314_v8  ;;  %v114_v36 = vsel %vm113_vm7, %v111_v26, %v108_v32 }
  0x48   :  { %v135_v37 = vadd.f32 %v116_v33, %v115_v30  ;;  %v140_v38 = vmul.f32 %v116_v33, %v316_v9  ;;  %v118_v39 = vadd.f32 %v114_v36, %v62_v28 }
  0x49   :  { %v141_v40 = vmul.f32 %v117_v34, %v323_v14 }
  0x4a   :  { %v136_v41 = vadd.f32 %v135_v37, %v117_v34  ;;  %v143_v42 = vadd.f32 %v140_v38, %v139_v35  ;;  %v142_v43 = vmul.f32 %v118_v39, %v328_v19 }
  0x4c   :  { %v137_v44 = vadd.f32 %v136_v41, %v118_v39  ;;  %v144_v45 = vadd.f32 %v143_v42, %v141_v40 }
  0x4e   :  { %161 = vst [vmem:[#allocation7 + $0x8] sm:$0xff] %v137_v44  ;;  %v145_v46 = vadd.f32 %v144_v45, %v142_v43 }
  0x50   :  { %163 = vst [vmem:[#allocation7 + $0x10] sm:$0xff] %v145_v46 }
  0x51   :  { %263 = shalt.err (!%p260_p0)
}
  0x52   :  { %179 = dma.vmem_to_hbm [thread:$0]  %s174_s1, 640, %s376_s2, [#allocation4], %s279_s12, %s279_s12, %s280_s13  }
  0x53   :  { %276 = dma.done.wait [#allocation4], 640  }
  0x54   :  { %277 = vsyncadd [#allocation4], 4294966656 }
  0x55   :  { %183 = vsyncpa [#allocation3], 1 }
  0x56   :  { %184 = vsyncpa [#allocation6], 1 }
  0x57   :  { %185 = vsyncpa [#allocation4], 1 }

</bundles_post_ra>
